<compile_context>
chip_gen: v5e
topology: v5e:2x2
jax: 0.10.0
libtpu: 0.0.40
codegen_flags: <defaults>
</compile_context>

<pallas_src>
import math
import functools

import jax
import jax.numpy as jnp
import numpy as np
from jax.experimental import pallas as pl
from jax.experimental.pallas import tpu as pltpu


def encoder_layer_kernel(x_ref, mask_ref,
                         wqkv_ref, bqkv_ref,
                         wo_ref, bo_ref,
                         g1_ref, be1_ref,
                         w1_ref, b1_ref, w2_ref, b2_ref,
                         g2_ref, be2_ref,
                         out_ref,
                         *, n_heads, d_k, d_model):
    """One grid step processes one batch element: (S, D) in VMEM."""
    x = x_ref[...]                      # (S, D) float32
    mask = mask_ref[...]                # (S, S) additive mask, float32
    seq = x.shape[0]

    # --- Fused QKV projection: one MXU pass, bf16 operands, f32 accum ------
    x_bf = x.astype(jnp.bfloat16)
    qkv = jnp.dot(x_bf, wqkv_ref[...],
                  preferred_element_type=jnp.float32) + bqkv_ref[...]   # (S, 3D)
    qkv_bf = qkv.astype(jnp.bfloat16)

    scale = 1.0 / math.sqrt(d_k)

    # --- Multi-head self-attention ------------------------------------------
    # Static loop over heads (n_heads is small). Each head's output is pushed
    # through its W_o row-block and accumulated in f32, so no concat relayout
    # and no (S, D) attention intermediate is materialized.
    attn_out = jnp.zeros((seq, d_model), jnp.float32)
    for h in range(n_heads):
        lo = h * d_k
        qh = qkv_bf[:, lo:lo + d_k]                               # (S, d_k)
        kh = qkv_bf[:, d_model + lo:d_model + lo + d_k]           # (S, d_k)
        vh = qkv_bf[:, 2 * d_model + lo:2 * d_model + lo + d_k]   # (S, d_k)

        # q @ k^T without an explicit transpose: contract last axes of both.
        scores = jax.lax.dot_general(
            qh, kh, (((1,), (1,)), ((), ())),
            preferred_element_type=jnp.float32) * scale + mask    # (S, S) f32

        m = jnp.max(scores, axis=-1, keepdims=True)
        e = jnp.exp(scores - m)
        denom = jnp.sum(e, axis=-1, keepdims=True)
        p = e * pl.reciprocal(denom, approx=True)                 # f32 softmax

        oh = jnp.dot(p.astype(jnp.bfloat16), vh,
                     preferred_element_type=jnp.float32)          # (S, d_k)

        # Accumulate this head's contribution of the output projection:
        # oh @ W_o[h*d_k:(h+1)*d_k, :]  (W_o passed pre-reshaped as (H, d_k, D))
        attn_out = attn_out + jnp.dot(
            oh.astype(jnp.bfloat16), wo_ref[h],
            preferred_element_type=jnp.float32)

    attn_out = attn_out + bo_ref[...]
    # dropout1 is identity (eval mode)

    # --- Residual + LayerNorm 1 (all f32 VPU math) --------------------------
    x1 = x + attn_out
    mu1 = jnp.mean(x1, axis=-1, keepdims=True)
    var1 = jnp.mean((x1 - mu1) ** 2, axis=-1, keepdims=True)
    x1n = (x1 - mu1) * jax.lax.rsqrt(var1 + 1e-5) * g1_ref[...] + be1_ref[...]

    # --- Position-wise feed-forward (bf16 matmuls, f32 accum) ---------------
    h1 = jnp.maximum(
        jnp.dot(x1n.astype(jnp.bfloat16), w1_ref[...],
                preferred_element_type=jnp.float32) + b1_ref[...],
        0.0)
    ff = jnp.dot(h1.astype(jnp.bfloat16), w2_ref[...],
                 preferred_element_type=jnp.float32) + b2_ref[...]
    # dropout2 is identity (eval mode)

    # --- Residual + LayerNorm 2 ----------------------------------------------
    x2 = x1n + ff
    mu2 = jnp.mean(x2, axis=-1, keepdims=True)
    var2 = jnp.mean((x2 - mu2) ** 2, axis=-1, keepdims=True)
    out_ref[...] = ((x2 - mu2) * jax.lax.rsqrt(var2 + 1e-5)
                    * g2_ref[...] + be2_ref[...])


def encoder_layer(src, src_mask, params, *, n_heads):
    B, S, D = src.shape
    d_ff = params["w1"].shape[1]
    d_k = D // n_heads

    # --- Wrapper-level weight prep (fused QKV, bf16 MXU operands) -----------
    wqkv = jnp.concatenate([params["wq"], params["wk"], params["wv"]],
                           axis=1).astype(jnp.bfloat16)              # (D, 3D)
    bqkv = jnp.concatenate([params["bq"], params["bk"], params["bv"]],
                           axis=1)                                   # (1, 3D) f32
    wo3 = params["wo"].astype(jnp.bfloat16).reshape(n_heads, d_k, D)  # (H, d_k, D)
    w1 = params["w1"].astype(jnp.bfloat16)
    w2 = params["w2"].astype(jnp.bfloat16)

    def const2d(shape):
        return pl.BlockSpec(shape, lambda b: (0, 0))

    kernel = functools.partial(encoder_layer_kernel,
                               n_heads=n_heads, d_k=d_k, d_model=D)

    return pl.pallas_call(
        kernel,
        out_shape=jax.ShapeDtypeStruct((B, S, D), jnp.float32),
        grid=(B,),
        in_specs=[
            pl.BlockSpec((None, S, D), lambda b: (b, 0, 0)),    # src (batch squeezed)
            const2d((S, S)),                                    # additive mask
            const2d((D, 3 * D)), const2d((1, 3 * D)),           # fused W_qkv, b_qkv
            pl.BlockSpec((n_heads, d_k, D), lambda b: (0, 0, 0)),  # W_o per head
            const2d((1, D)),                                    # b_o
            const2d((1, D)), const2d((1, D)),                   # norm1 gamma, beta
            const2d((D, d_ff)), const2d((1, d_ff)),             # fc1
            const2d((d_ff, D)), const2d((1, D)),                # fc2
            const2d((1, D)), const2d((1, D)),                   # norm2 gamma, beta
        ],
        out_specs=pl.BlockSpec((None, S, D), lambda b: (b, 0, 0)),
        compiler_params=pltpu.CompilerParams(
            dimension_semantics=("parallel",),
            # Raise the scoped VMEM limit above the 16/32 MiB defaults; kept
            # below v7x's 64 MiB physical VMEM.
            vmem_limit_bytes=48 * 1024 * 1024),
    )(src, src_mask,
      wqkv, bqkv, wo3, params["bo"],
      params["g1"], params["be1"],
      w1, params["b1"], w2, params["b2"],
      params["g2"], params["be2"])


def reference_encoder_layer(src, src_mask, params, *, n_heads):
    """Pure-JAX f32 reference matching the PyTorch forward (eval mode)."""
    B, S, D = src.shape
    d_k = D // n_heads

    def lin(x, w, b):
        return jnp.einsum("bsd,df->bsf", x, w) + b

    q = lin(src, params["wq"], params["bq"])
    k = lin(src, params["wk"], params["bk"])
    v = lin(src, params["wv"], params["bv"])
    q = q.reshape(B, S, n_heads, d_k).transpose(0, 2, 1, 3)
    k = k.reshape(B, S, n_heads, d_k).transpose(0, 2, 1, 3)
    v = v.reshape(B, S, n_heads, d_k).transpose(0, 2, 1, 3)
    scores = jnp.einsum("bhqd,bhkd->bhqk", q, k) / math.sqrt(d_k)
    scores = scores + src_mask  # (S,S) broadcasts over (B,H,S,S)
    p = jax.nn.softmax(scores, axis=-1)
    o = jnp.einsum("bhqk,bhkd->bhqd", p, v)
    o = o.transpose(0, 2, 1, 3).reshape(B, S, D)
    attn_out = lin(o, params["wo"], params["bo"])

    def layernorm(x, g, b):
        mu = jnp.mean(x, axis=-1, keepdims=True)
        var = jnp.mean((x - mu) ** 2, axis=-1, keepdims=True)
        return (x - mu) * jax.lax.rsqrt(var + 1e-5) * g + b

    x1 = layernorm(src + attn_out, params["g1"], params["be1"])
    ff = lin(jnp.maximum(lin(x1, params["w1"], params["b1"]), 0.0),
             params["w2"], params["b2"])
    return layernorm(x1 + ff, params["g2"], params["be2"])


if __name__ == "__main__":
    B, S, D, H, d_ff = 2, 8, 32, 4, 64

    key = jax.random.PRNGKey(0)
    keys = jax.random.split(key, 16)

    def uinit(k, shape, fan_in):
        bound = 1.0 / math.sqrt(fan_in)
        return jax.random.uniform(k, shape, jnp.float32, -bound, bound)

    params = {
        "wq": uinit(keys[0], (D, D), D), "bq": uinit(keys[1], (1, D), D),
        "wk": uinit(keys[2], (D, D), D), "bk": uinit(keys[3], (1, D), D),
        "wv": uinit(keys[4], (D, D), D), "bv": uinit(keys[5], (1, D), D),
        "wo": uinit(keys[6], (D, D), D), "bo": uinit(keys[7], (1, D), D),
        "g1": jnp.ones((1, D), jnp.float32), "be1": jnp.zeros((1, D), jnp.float32),
        "w1": uinit(keys[8], (D, d_ff), D), "b1": uinit(keys[9], (1, d_ff), D),
        "w2": uinit(keys[10], (d_ff, D), d_ff), "b2": uinit(keys[11], (1, D), d_ff),
        "g2": jnp.ones((1, D), jnp.float32), "be2": jnp.zeros((1, D), jnp.float32),
    }

    src = jax.random.normal(keys[12], (B, S, D), jnp.float32)
    # additive causal-style mask (S, S), broadcast like the PyTorch `mask + scores`
    src_mask = jnp.where(
        jnp.arange(S)[None, :] > jnp.arange(S)[:, None], -1e9, 0.0
    ).astype(jnp.float32)

    out = encoder_layer(src, src_mask, params, n_heads=H)
    out = jax.block_until_ready(out)

    ref = reference_encoder_layer(src, src_mask, params, n_heads=H)
    # Tolerance accounts for bf16 MXU operands + approx reciprocal in the
    # kernel vs. the full-f32 reference; structural errors would be O(1).
    np.testing.assert_allclose(np.asarray(out), np.asarray(ref),
                               rtol=5e-2, atol=5e-2)

    print("KERNEL_OK")
</pallas_src>

<mosaic_0001>
module attributes {stable_mosaic.version = 11 : i64} {
  func.func @encoder_layer_kernel(%arg0: i32, %arg1: memref<1x8x32xf32, #tpu.memory_space<vmem>>, %arg2: memref<8x8xf32, #tpu.memory_space<vmem>>, %arg3: memref<32x96xbf16, #tpu.memory_space<vmem>>, %arg4: memref<1x96xf32, #tpu.memory_space<vmem>>, %arg5: memref<4x8x32xbf16, #tpu.memory_space<vmem>>, %arg6: memref<1x32xf32, #tpu.memory_space<vmem>>, %arg7: memref<1x32xf32, #tpu.memory_space<vmem>>, %arg8: memref<1x32xf32, #tpu.memory_space<vmem>>, %arg9: memref<32x64xbf16, #tpu.memory_space<vmem>>, %arg10: memref<1x64xf32, #tpu.memory_space<vmem>>, %arg11: memref<64x32xbf16, #tpu.memory_space<vmem>>, %arg12: memref<1x32xf32, #tpu.memory_space<vmem>>, %arg13: memref<1x32xf32, #tpu.memory_space<vmem>>, %arg14: memref<1x32xf32, #tpu.memory_space<vmem>>, %arg15: memref<1x8x32xf32, #tpu.memory_space<vmem>>) attributes {dimension_semantics = [#tpu.dimension_semantics<parallel>], iteration_bounds = array<i64: 2>, scalar_prefetch = 0 : i64, scratch_operands = 0 : i64, tpu.core_type = #tpu.core_type<tc>, window_params = [{transform_indices = @transform_0, window_bounds = array<i64: 1, 8, 32>}, {pipeline_mode = #tpu.pipeline_mode<synchronous>, transform_indices = @transform_1, window_bounds = array<i64: 8, 8>}, {pipeline_mode = #tpu.pipeline_mode<synchronous>, transform_indices = @transform_2, window_bounds = array<i64: 32, 96>}, {pipeline_mode = #tpu.pipeline_mode<synchronous>, transform_indices = @transform_3, window_bounds = array<i64: 1, 96>}, {pipeline_mode = #tpu.pipeline_mode<synchronous>, transform_indices = @transform_4, window_bounds = array<i64: 4, 8, 32>}, {pipeline_mode = #tpu.pipeline_mode<synchronous>, transform_indices = @transform_5, window_bounds = array<i64: 1, 32>}, {pipeline_mode = #tpu.pipeline_mode<synchronous>, transform_indices = @transform_6, window_bounds = array<i64: 1, 32>}, {pipeline_mode = #tpu.pipeline_mode<synchronous>, transform_indices = @transform_7, window_bounds = array<i64: 1, 32>}, {pipeline_mode = #tpu.pipeline_mode<synchronous>, transform_indices = @transform_8, window_bounds = array<i64: 32, 64>}, {pipeline_mode = #tpu.pipeline_mode<synchronous>, transform_indices = @transform_9, window_bounds = array<i64: 1, 64>}, {pipeline_mode = #tpu.pipeline_mode<synchronous>, transform_indices = @transform_10, window_bounds = array<i64: 64, 32>}, {pipeline_mode = #tpu.pipeline_mode<synchronous>, transform_indices = @transform_11, window_bounds = array<i64: 1, 32>}, {pipeline_mode = #tpu.pipeline_mode<synchronous>, transform_indices = @transform_12, window_bounds = array<i64: 1, 32>}, {pipeline_mode = #tpu.pipeline_mode<synchronous>, transform_indices = @transform_13, window_bounds = array<i64: 1, 32>}, {transform_indices = @transform_14, window_bounds = array<i64: 1, 8, 32>}]} {
    %c0 = arith.constant 0 : index
    %c0_0 = arith.constant 0 : index
    %c0_1 = arith.constant 0 : index
    %0 = vector.load %arg1[%c0, %c0_0, %c0_1] : memref<1x8x32xf32, #tpu.memory_space<vmem>>, vector<1x8x32xf32>
    %1 = vector.shape_cast %0 : vector<1x8x32xf32> to vector<8x32xf32>
    %c0_2 = arith.constant 0 : index
    %c0_3 = arith.constant 0 : index
    %2 = vector.load %arg2[%c0_2, %c0_3] : memref<8x8xf32, #tpu.memory_space<vmem>>, vector<8x8xf32>
    %3 = arith.truncf %1 : vector<8x32xf32> to vector<8x32xbf16>
    %c0_4 = arith.constant 0 : index
    %c0_5 = arith.constant 0 : index
    %4 = vector.load %arg3[%c0_4, %c0_5] : memref<32x96xbf16, #tpu.memory_space<vmem>>, vector<32x96xbf16>
    %cst = arith.constant dense<0.000000e+00> : vector<8x96xf32>
    %5 = tpu.matmul %3, %4, %cst {dimension_numbers = #tpu.dot_dimension_numbers<[1], [0], [0], [1], [0, 0, 1, 1], [], []>} : vector<8x32xbf16>, vector<32x96xbf16>, vector<8x96xf32> -> vector<8x96xf32>
    %c0_6 = arith.constant 0 : index
    %c0_7 = arith.constant 0 : index
    %6 = vector.load %arg4[%c0_6, %c0_7] : memref<1x96xf32, #tpu.memory_space<vmem>>, vector<1x96xf32>
    %7 = vector.broadcast %6 : vector<1x96xf32> to vector<8x96xf32>
    %8 = arith.addf %5, %7 : vector<8x96xf32>
    %9 = arith.truncf %8 : vector<8x96xf32> to vector<8x96xbf16>
    %cst_8 = arith.constant 0.000000e+00 : f32
    %10 = vector.broadcast %cst_8 : f32 to vector<8x32xf32>
    %11 = vector.extract_strided_slice %9 {offsets = [0, 0], sizes = [8, 8], strides = [1, 1]} : vector<8x96xbf16> to vector<8x8xbf16>
    %12 = vector.extract_strided_slice %9 {offsets = [0, 32], sizes = [8, 8], strides = [1, 1]} : vector<8x96xbf16> to vector<8x8xbf16>
    %13 = vector.extract_strided_slice %9 {offsets = [0, 64], sizes = [8, 8], strides = [1, 1]} : vector<8x96xbf16> to vector<8x8xbf16>
    %cst_9 = arith.constant dense<0.000000e+00> : vector<8x8xf32>
    %14 = tpu.matmul %11, %12, %cst_9 {dimension_numbers = #tpu.dot_dimension_numbers<[1], [1], [0], [0], [0, 0, 1, 0], [], []>} : vector<8x8xbf16>, vector<8x8xbf16>, vector<8x8xf32> -> vector<8x8xf32>
    %cst_10 = arith.constant 0.353553385 : f32
    %15 = vector.broadcast %cst_10 : f32 to vector<8x8xf32>
    %16 = arith.mulf %14, %15 : vector<8x8xf32>
    %17 = arith.addf %16, %2 : vector<8x8xf32>
    %cst_11 = arith.constant dense<0xFF800000> : vector<8xf32>
    %18 = vector.multi_reduction <maximumf>, %17, %cst_11 [1] : vector<8x8xf32> to vector<8xf32>
    %19 = vector.shape_cast %18 : vector<8xf32> to vector<8x1xf32>
    %20 = vector.broadcast %19 : vector<8x1xf32> to vector<8x8xf32>
    %21 = arith.subf %17, %20 : vector<8x8xf32>
    %22 = math.exp %21 : vector<8x8xf32>
    %cst_12 = arith.constant dense<0.000000e+00> : vector<8xf32>
    %23 = vector.multi_reduction <add>, %22, %cst_12 [1] : vector<8x8xf32> to vector<8xf32>
    %24 = vector.shape_cast %23 : vector<8xf32> to vector<8x1xf32>
    %25 = tpu.reciprocal %24 {approx = true} : vector<8x1xf32> -> vector<8x1xf32>
    %26 = vector.broadcast %25 : vector<8x1xf32> to vector<8x8xf32>
    %27 = arith.mulf %22, %26 : vector<8x8xf32>
    %28 = arith.truncf %27 : vector<8x8xf32> to vector<8x8xbf16>
    %cst_13 = arith.constant dense<0.000000e+00> : vector<8x8xf32>
    %29 = tpu.matmul %28, %13, %cst_13 {dimension_numbers = #tpu.dot_dimension_numbers<[1], [0], [0], [1], [0, 0, 1, 1], [], []>} : vector<8x8xbf16>, vector<8x8xbf16>, vector<8x8xf32> -> vector<8x8xf32>
    %30 = arith.truncf %29 : vector<8x8xf32> to vector<8x8xbf16>
    %c0_14 = arith.constant 0 : index
    %c0_15 = arith.constant 0 : index
    %c0_16 = arith.constant 0 : index
    %31 = vector.load %arg5[%c0_14, %c0_15, %c0_16] : memref<4x8x32xbf16, #tpu.memory_space<vmem>>, vector<1x8x32xbf16>
    %32 = vector.shape_cast %31 : vector<1x8x32xbf16> to vector<8x32xbf16>
    %cst_17 = arith.constant dense<0.000000e+00> : vector<8x32xf32>
    %33 = tpu.matmul %30, %32, %cst_17 {dimension_numbers = #tpu.dot_dimension_numbers<[1], [0], [0], [1], [0, 0, 1, 1], [], []>} : vector<8x8xbf16>, vector<8x32xbf16>, vector<8x32xf32> -> vector<8x32xf32>
    %34 = arith.addf %10, %33 : vector<8x32xf32>
    %35 = vector.extract_strided_slice %9 {offsets = [0, 8], sizes = [8, 8], strides = [1, 1]} : vector<8x96xbf16> to vector<8x8xbf16>
    %36 = vector.extract_strided_slice %9 {offsets = [0, 40], sizes = [8, 8], strides = [1, 1]} : vector<8x96xbf16> to vector<8x8xbf16>
    %37 = vector.extract_strided_slice %9 {offsets = [0, 72], sizes = [8, 8], strides = [1, 1]} : vector<8x96xbf16> to vector<8x8xbf16>
    %cst_18 = arith.constant dense<0.000000e+00> : vector<8x8xf32>
    %38 = tpu.matmul %35, %36, %cst_18 {dimension_numbers = #tpu.dot_dimension_numbers<[1], [1], [0], [0], [0, 0, 1, 0], [], []>} : vector<8x8xbf16>, vector<8x8xbf16>, vector<8x8xf32> -> vector<8x8xf32>
    %cst_19 = arith.constant 0.353553385 : f32
    %39 = vector.broadcast %cst_19 : f32 to vector<8x8xf32>
    %40 = arith.mulf %38, %39 : vector<8x8xf32>
    %41 = arith.addf %40, %2 : vector<8x8xf32>
    %cst_20 = arith.constant dense<0xFF800000> : vector<8xf32>
    %42 = vector.multi_reduction <maximumf>, %41, %cst_20 [1] : vector<8x8xf32> to vector<8xf32>
    %43 = vector.shape_cast %42 : vector<8xf32> to vector<8x1xf32>
    %44 = vector.broadcast %43 : vector<8x1xf32> to vector<8x8xf32>
    %45 = arith.subf %41, %44 : vector<8x8xf32>
    %46 = math.exp %45 : vector<8x8xf32>
    %cst_21 = arith.constant dense<0.000000e+00> : vector<8xf32>
    %47 = vector.multi_reduction <add>, %46, %cst_21 [1] : vector<8x8xf32> to vector<8xf32>
    %48 = vector.shape_cast %47 : vector<8xf32> to vector<8x1xf32>
    %49 = tpu.reciprocal %48 {approx = true} : vector<8x1xf32> -> vector<8x1xf32>
    %50 = vector.broadcast %49 : vector<8x1xf32> to vector<8x8xf32>
    %51 = arith.mulf %46, %50 : vector<8x8xf32>
    %52 = arith.truncf %51 : vector<8x8xf32> to vector<8x8xbf16>
    %cst_22 = arith.constant dense<0.000000e+00> : vector<8x8xf32>
    %53 = tpu.matmul %52, %37, %cst_22 {dimension_numbers = #tpu.dot_dimension_numbers<[1], [0], [0], [1], [0, 0, 1, 1], [], []>} : vector<8x8xbf16>, vector<8x8xbf16>, vector<8x8xf32> -> vector<8x8xf32>
    %54 = arith.truncf %53 : vector<8x8xf32> to vector<8x8xbf16>
    %c1 = arith.constant 1 : index
    %c0_23 = arith.constant 0 : index
    %c0_24 = arith.constant 0 : index
    %55 = vector.load %arg5[%c1, %c0_23, %c0_24] : memref<4x8x32xbf16, #tpu.memory_space<vmem>>, vector<1x8x32xbf16>
    %56 = vector.shape_cast %55 : vector<1x8x32xbf16> to vector<8x32xbf16>
    %cst_25 = arith.constant dense<0.000000e+00> : vector<8x32xf32>
    %57 = tpu.matmul %54, %56, %cst_25 {dimension_numbers = #tpu.dot_dimension_numbers<[1], [0], [0], [1], [0, 0, 1, 1], [], []>} : vector<8x8xbf16>, vector<8x32xbf16>, vector<8x32xf32> -> vector<8x32xf32>
    %58 = arith.addf %34, %57 : vector<8x32xf32>
    %59 = vector.extract_strided_slice %9 {offsets = [0, 16], sizes = [8, 8], strides = [1, 1]} : vector<8x96xbf16> to vector<8x8xbf16>
    %60 = vector.extract_strided_slice %9 {offsets = [0, 48], sizes = [8, 8], strides = [1, 1]} : vector<8x96xbf16> to vector<8x8xbf16>
    %61 = vector.extract_strided_slice %9 {offsets = [0, 80], sizes = [8, 8], strides = [1, 1]} : vector<8x96xbf16> to vector<8x8xbf16>
    %cst_26 = arith.constant dense<0.000000e+00> : vector<8x8xf32>
    %62 = tpu.matmul %59, %60, %cst_26 {dimension_numbers = #tpu.dot_dimension_numbers<[1], [1], [0], [0], [0, 0, 1, 0], [], []>} : vector<8x8xbf16>, vector<8x8xbf16>, vector<8x8xf32> -> vector<8x8xf32>
    %cst_27 = arith.constant 0.353553385 : f32
    %63 = vector.broadcast %cst_27 : f32 to vector<8x8xf32>
    %64 = arith.mulf %62, %63 : vector<8x8xf32>
    %65 = arith.addf %64, %2 : vector<8x8xf32>
    %cst_28 = arith.constant dense<0xFF800000> : vector<8xf32>
    %66 = vector.multi_reduction <maximumf>, %65, %cst_28 [1] : vector<8x8xf32> to vector<8xf32>
    %67 = vector.shape_cast %66 : vector<8xf32> to vector<8x1xf32>
    %68 = vector.broadcast %67 : vector<8x1xf32> to vector<8x8xf32>
    %69 = arith.subf %65, %68 : vector<8x8xf32>
    %70 = math.exp %69 : vector<8x8xf32>
    %cst_29 = arith.constant dense<0.000000e+00> : vector<8xf32>
    %71 = vector.multi_reduction <add>, %70, %cst_29 [1] : vector<8x8xf32> to vector<8xf32>
    %72 = vector.shape_cast %71 : vector<8xf32> to vector<8x1xf32>
    %73 = tpu.reciprocal %72 {approx = true} : vector<8x1xf32> -> vector<8x1xf32>
    %74 = vector.broadcast %73 : vector<8x1xf32> to vector<8x8xf32>
    %75 = arith.mulf %70, %74 : vector<8x8xf32>
    %76 = arith.truncf %75 : vector<8x8xf32> to vector<8x8xbf16>
    %cst_30 = arith.constant dense<0.000000e+00> : vector<8x8xf32>
    %77 = tpu.matmul %76, %61, %cst_30 {dimension_numbers = #tpu.dot_dimension_numbers<[1], [0], [0], [1], [0, 0, 1, 1], [], []>} : vector<8x8xbf16>, vector<8x8xbf16>, vector<8x8xf32> -> vector<8x8xf32>
    %78 = arith.truncf %77 : vector<8x8xf32> to vector<8x8xbf16>
    %c2 = arith.constant 2 : index
    %c0_31 = arith.constant 0 : index
    %c0_32 = arith.constant 0 : index
    %79 = vector.load %arg5[%c2, %c0_31, %c0_32] : memref<4x8x32xbf16, #tpu.memory_space<vmem>>, vector<1x8x32xbf16>
    %80 = vector.shape_cast %79 : vector<1x8x32xbf16> to vector<8x32xbf16>
    %cst_33 = arith.constant dense<0.000000e+00> : vector<8x32xf32>
    %81 = tpu.matmul %78, %80, %cst_33 {dimension_numbers = #tpu.dot_dimension_numbers<[1], [0], [0], [1], [0, 0, 1, 1], [], []>} : vector<8x8xbf16>, vector<8x32xbf16>, vector<8x32xf32> -> vector<8x32xf32>
    %82 = arith.addf %58, %81 : vector<8x32xf32>
    %83 = vector.extract_strided_slice %9 {offsets = [0, 24], sizes = [8, 8], strides = [1, 1]} : vector<8x96xbf16> to vector<8x8xbf16>
    %84 = vector.extract_strided_slice %9 {offsets = [0, 56], sizes = [8, 8], strides = [1, 1]} : vector<8x96xbf16> to vector<8x8xbf16>
    %85 = vector.extract_strided_slice %9 {offsets = [0, 88], sizes = [8, 8], strides = [1, 1]} : vector<8x96xbf16> to vector<8x8xbf16>
    %cst_34 = arith.constant dense<0.000000e+00> : vector<8x8xf32>
    %86 = tpu.matmul %83, %84, %cst_34 {dimension_numbers = #tpu.dot_dimension_numbers<[1], [1], [0], [0], [0, 0, 1, 0], [], []>} : vector<8x8xbf16>, vector<8x8xbf16>, vector<8x8xf32> -> vector<8x8xf32>
    %cst_35 = arith.constant 0.353553385 : f32
    %87 = vector.broadcast %cst_35 : f32 to vector<8x8xf32>
    %88 = arith.mulf %86, %87 : vector<8x8xf32>
    %89 = arith.addf %88, %2 : vector<8x8xf32>
    %cst_36 = arith.constant dense<0xFF800000> : vector<8xf32>
    %90 = vector.multi_reduction <maximumf>, %89, %cst_36 [1] : vector<8x8xf32> to vector<8xf32>
    %91 = vector.shape_cast %90 : vector<8xf32> to vector<8x1xf32>
    %92 = vector.broadcast %91 : vector<8x1xf32> to vector<8x8xf32>
    %93 = arith.subf %89, %92 : vector<8x8xf32>
    %94 = math.exp %93 : vector<8x8xf32>
    %cst_37 = arith.constant dense<0.000000e+00> : vector<8xf32>
    %95 = vector.multi_reduction <add>, %94, %cst_37 [1] : vector<8x8xf32> to vector<8xf32>
    %96 = vector.shape_cast %95 : vector<8xf32> to vector<8x1xf32>
    %97 = tpu.reciprocal %96 {approx = true} : vector<8x1xf32> -> vector<8x1xf32>
    %98 = vector.broadcast %97 : vector<8x1xf32> to vector<8x8xf32>
    %99 = arith.mulf %94, %98 : vector<8x8xf32>
    %100 = arith.truncf %99 : vector<8x8xf32> to vector<8x8xbf16>
    %cst_38 = arith.constant dense<0.000000e+00> : vector<8x8xf32>
    %101 = tpu.matmul %100, %85, %cst_38 {dimension_numbers = #tpu.dot_dimension_numbers<[1], [0], [0], [1], [0, 0, 1, 1], [], []>} : vector<8x8xbf16>, vector<8x8xbf16>, vector<8x8xf32> -> vector<8x8xf32>
    %102 = arith.truncf %101 : vector<8x8xf32> to vector<8x8xbf16>
    %c3 = arith.constant 3 : index
    %c0_39 = arith.constant 0 : index
    %c0_40 = arith.constant 0 : index
    %103 = vector.load %arg5[%c3, %c0_39, %c0_40] : memref<4x8x32xbf16, #tpu.memory_space<vmem>>, vector<1x8x32xbf16>
    %104 = vector.shape_cast %103 : vector<1x8x32xbf16> to vector<8x32xbf16>
    %cst_41 = arith.constant dense<0.000000e+00> : vector<8x32xf32>
    %105 = tpu.matmul %102, %104, %cst_41 {dimension_numbers = #tpu.dot_dimension_numbers<[1], [0], [0], [1], [0, 0, 1, 1], [], []>} : vector<8x8xbf16>, vector<8x32xbf16>, vector<8x32xf32> -> vector<8x32xf32>
    %106 = arith.addf %82, %105 : vector<8x32xf32>
    %c0_42 = arith.constant 0 : index
    %c0_43 = arith.constant 0 : index
    %107 = vector.load %arg6[%c0_42, %c0_43] : memref<1x32xf32, #tpu.memory_space<vmem>>, vector<1x32xf32>
    %108 = vector.broadcast %107 : vector<1x32xf32> to vector<8x32xf32>
    %109 = arith.addf %106, %108 : vector<8x32xf32>
    %110 = arith.addf %1, %109 : vector<8x32xf32>
    %cst_44 = arith.constant dense<0.000000e+00> : vector<8xf32>
    %111 = vector.multi_reduction <add>, %110, %cst_44 [1] : vector<8x32xf32> to vector<8xf32>
    %112 = vector.shape_cast %111 : vector<8xf32> to vector<8x1xf32>
    %cst_45 = arith.constant 3.200000e+01 : f32
    %113 = vector.broadcast %cst_45 : f32 to vector<8x1xf32>
    %114 = arith.divf %112, %113 : vector<8x1xf32>
    %115 = vector.broadcast %114 : vector<8x1xf32> to vector<8x32xf32>
    %116 = arith.subf %110, %115 : vector<8x32xf32>
    %117 = arith.mulf %116, %116 : vector<8x32xf32>
    %cst_46 = arith.constant dense<0.000000e+00> : vector<8xf32>
    %118 = vector.multi_reduction <add>, %117, %cst_46 [1] : vector<8x32xf32> to vector<8xf32>
    %119 = vector.shape_cast %118 : vector<8xf32> to vector<8x1xf32>
    %cst_47 = arith.constant 3.200000e+01 : f32
    %120 = vector.broadcast %cst_47 : f32 to vector<8x1xf32>
    %121 = arith.divf %119, %120 : vector<8x1xf32>
    %122 = vector.broadcast %114 : vector<8x1xf32> to vector<8x32xf32>
    %123 = arith.subf %110, %122 : vector<8x32xf32>
    %cst_48 = arith.constant 9.99999974E-6 : f32
    %124 = vector.broadcast %cst_48 : f32 to vector<8x1xf32>
    %125 = arith.addf %121, %124 : vector<8x1xf32>
    %126 = math.rsqrt %125 : vector<8x1xf32>
    %127 = vector.broadcast %126 : vector<8x1xf32> to vector<8x32xf32>
    %128 = arith.mulf %123, %127 : vector<8x32xf32>
    %c0_49 = arith.constant 0 : index
    %c0_50 = arith.constant 0 : index
    %129 = vector.load %arg7[%c0_49, %c0_50] : memref<1x32xf32, #tpu.memory_space<vmem>>, vector<1x32xf32>
    %130 = vector.broadcast %129 : vector<1x32xf32> to vector<8x32xf32>
    %131 = arith.mulf %128, %130 : vector<8x32xf32>
    %c0_51 = arith.constant 0 : index
    %c0_52 = arith.constant 0 : index
    %132 = vector.load %arg8[%c0_51, %c0_52] : memref<1x32xf32, #tpu.memory_space<vmem>>, vector<1x32xf32>
    %133 = vector.broadcast %132 : vector<1x32xf32> to vector<8x32xf32>
    %134 = arith.addf %131, %133 : vector<8x32xf32>
    %135 = arith.truncf %134 : vector<8x32xf32> to vector<8x32xbf16>
    %c0_53 = arith.constant 0 : index
    %c0_54 = arith.constant 0 : index
    %136 = vector.load %arg9[%c0_53, %c0_54] : memref<32x64xbf16, #tpu.memory_space<vmem>>, vector<32x64xbf16>
    %cst_55 = arith.constant dense<0.000000e+00> : vector<8x64xf32>
    %137 = tpu.matmul %135, %136, %cst_55 {dimension_numbers = #tpu.dot_dimension_numbers<[1], [0], [0], [1], [0, 0, 1, 1], [], []>} : vector<8x32xbf16>, vector<32x64xbf16>, vector<8x64xf32> -> vector<8x64xf32>
    %c0_56 = arith.constant 0 : index
    %c0_57 = arith.constant 0 : index
    %138 = vector.load %arg10[%c0_56, %c0_57] : memref<1x64xf32, #tpu.memory_space<vmem>>, vector<1x64xf32>
    %139 = vector.broadcast %138 : vector<1x64xf32> to vector<8x64xf32>
    %140 = arith.addf %137, %139 : vector<8x64xf32>
    %cst_58 = arith.constant 0.000000e+00 : f32
    %141 = vector.broadcast %cst_58 : f32 to vector<8x64xf32>
    %142 = arith.maximumf %140, %141 : vector<8x64xf32>
    %143 = arith.truncf %142 : vector<8x64xf32> to vector<8x64xbf16>
    %c0_59 = arith.constant 0 : index
    %c0_60 = arith.constant 0 : index
    %144 = vector.load %arg11[%c0_59, %c0_60] : memref<64x32xbf16, #tpu.memory_space<vmem>>, vector<64x32xbf16>
    %cst_61 = arith.constant dense<0.000000e+00> : vector<8x32xf32>
    %145 = tpu.matmul %143, %144, %cst_61 {dimension_numbers = #tpu.dot_dimension_numbers<[1], [0], [0], [1], [0, 0, 1, 1], [], []>} : vector<8x64xbf16>, vector<64x32xbf16>, vector<8x32xf32> -> vector<8x32xf32>
    %c0_62 = arith.constant 0 : index
    %c0_63 = arith.constant 0 : index
    %146 = vector.load %arg12[%c0_62, %c0_63] : memref<1x32xf32, #tpu.memory_space<vmem>>, vector<1x32xf32>
    %147 = vector.broadcast %146 : vector<1x32xf32> to vector<8x32xf32>
    %148 = arith.addf %145, %147 : vector<8x32xf32>
    %149 = arith.addf %134, %148 : vector<8x32xf32>
    %cst_64 = arith.constant dense<0.000000e+00> : vector<8xf32>
    %150 = vector.multi_reduction <add>, %149, %cst_64 [1] : vector<8x32xf32> to vector<8xf32>
    %151 = vector.shape_cast %150 : vector<8xf32> to vector<8x1xf32>
    %cst_65 = arith.constant 3.200000e+01 : f32
    %152 = vector.broadcast %cst_65 : f32 to vector<8x1xf32>
    %153 = arith.divf %151, %152 : vector<8x1xf32>
    %154 = vector.broadcast %153 : vector<8x1xf32> to vector<8x32xf32>
    %155 = arith.subf %149, %154 : vector<8x32xf32>
    %156 = arith.mulf %155, %155 : vector<8x32xf32>
    %cst_66 = arith.constant dense<0.000000e+00> : vector<8xf32>
    %157 = vector.multi_reduction <add>, %156, %cst_66 [1] : vector<8x32xf32> to vector<8xf32>
    %158 = vector.shape_cast %157 : vector<8xf32> to vector<8x1xf32>
    %cst_67 = arith.constant 3.200000e+01 : f32
    %159 = vector.broadcast %cst_67 : f32 to vector<8x1xf32>
    %160 = arith.divf %158, %159 : vector<8x1xf32>
    %161 = vector.broadcast %153 : vector<8x1xf32> to vector<8x32xf32>
    %162 = arith.subf %149, %161 : vector<8x32xf32>
    %cst_68 = arith.constant 9.99999974E-6 : f32
    %163 = vector.broadcast %cst_68 : f32 to vector<8x1xf32>
    %164 = arith.addf %160, %163 : vector<8x1xf32>
    %165 = math.rsqrt %164 : vector<8x1xf32>
    %166 = vector.broadcast %165 : vector<8x1xf32> to vector<8x32xf32>
    %167 = arith.mulf %162, %166 : vector<8x32xf32>
    %c0_69 = arith.constant 0 : index
    %c0_70 = arith.constant 0 : index
    %168 = vector.load %arg13[%c0_69, %c0_70] : memref<1x32xf32, #tpu.memory_space<vmem>>, vector<1x32xf32>
    %169 = vector.broadcast %168 : vector<1x32xf32> to vector<8x32xf32>
    %170 = arith.mulf %167, %169 : vector<8x32xf32>
    %c0_71 = arith.constant 0 : index
    %c0_72 = arith.constant 0 : index
    %171 = vector.load %arg14[%c0_71, %c0_72] : memref<1x32xf32, #tpu.memory_space<vmem>>, vector<1x32xf32>
    %172 = vector.broadcast %171 : vector<1x32xf32> to vector<8x32xf32>
    %173 = arith.addf %170, %172 : vector<8x32xf32>
    %c0_73 = arith.constant 0 : index
    %c0_74 = arith.constant 0 : index
    %c0_75 = arith.constant 0 : index
    %174 = vector.load %arg15[%c0_73, %c0_74, %c0_75] : memref<1x8x32xf32, #tpu.memory_space<vmem>>, vector<1x8x32xf32>
    %175 = vector.shape_cast %174 : vector<1x8x32xf32> to vector<8x32xf32>
    %176 = vector.shape_cast %173 : vector<8x32xf32> to vector<1x8x32xf32>
    tpu.vector_store %arg15[%c0_73, %c0_74, %c0_75], %176 {strides = array<i32>} : memref<1x8x32xf32, #tpu.memory_space<vmem>>, vector<1x8x32xf32>,
    return
  }
  func.func @transform_0(%arg0: i32) -> (i32, i32, i32) {
    %c0_i32 = arith.constant 0 : i32
    %c0_i32_0 = arith.constant 0 : i32
    %c0_i32_1 = arith.constant 0 : i32
    return %arg0, %c0_i32, %c0_i32_0 : i32, i32, i32
  }
  func.func @transform_1(%arg0: i32) -> (i32, i32) {
    %c0_i32 = arith.constant 0 : i32
    %c0_i32_0 = arith.constant 0 : i32
    %c0_i32_1 = arith.constant 0 : i32
    return %c0_i32, %c0_i32_0 : i32, i32
  }
  func.func @transform_2(%arg0: i32) -> (i32, i32) {
    %c0_i32 = arith.constant 0 : i32
    %c0_i32_0 = arith.constant 0 : i32
    %c0_i32_1 = arith.constant 0 : i32
    return %c0_i32, %c0_i32_0 : i32, i32
  }
  func.func @transform_3(%arg0: i32) -> (i32, i32) {
    %c0_i32 = arith.constant 0 : i32
    %c0_i32_0 = arith.constant 0 : i32
    %c0_i32_1 = arith.constant 0 : i32
    return %c0_i32, %c0_i32_0 : i32, i32
  }
  func.func @transform_4(%arg0: i32) -> (i32, i32, i32) {
    %c0_i32 = arith.constant 0 : i32
    %c0_i32_0 = arith.constant 0 : i32
    %c0_i32_1 = arith.constant 0 : i32
    %c0_i32_2 = arith.constant 0 : i32
    return %c0_i32, %c0_i32_0, %c0_i32_1 : i32, i32, i32
  }
  func.func @transform_5(%arg0: i32) -> (i32, i32) {
    %c0_i32 = arith.constant 0 : i32
    %c0_i32_0 = arith.constant 0 : i32
    %c0_i32_1 = arith.constant 0 : i32
    return %c0_i32, %c0_i32_0 : i32, i32
  }
  func.func @transform_6(%arg0: i32) -> (i32, i32) {
    %c0_i32 = arith.constant 0 : i32
    %c0_i32_0 = arith.constant 0 : i32
    %c0_i32_1 = arith.constant 0 : i32
    return %c0_i32, %c0_i32_0 : i32, i32
  }
  func.func @transform_7(%arg0: i32) -> (i32, i32) {
    %c0_i32 = arith.constant 0 : i32
    %c0_i32_0 = arith.constant 0 : i32
    %c0_i32_1 = arith.constant 0 : i32
    return %c0_i32, %c0_i32_0 : i32, i32
  }
  func.func @transform_8(%arg0: i32) -> (i32, i32) {
    %c0_i32 = arith.constant 0 : i32
    %c0_i32_0 = arith.constant 0 : i32
    %c0_i32_1 = arith.constant 0 : i32
    return %c0_i32, %c0_i32_0 : i32, i32
  }
  func.func @transform_9(%arg0: i32) -> (i32, i32) {
    %c0_i32 = arith.constant 0 : i32
    %c0_i32_0 = arith.constant 0 : i32
    %c0_i32_1 = arith.constant 0 : i32
    return %c0_i32, %c0_i32_0 : i32, i32
  }
  func.func @transform_10(%arg0: i32) -> (i32, i32) {
    %c0_i32 = arith.constant 0 : i32
    %c0_i32_0 = arith.constant 0 : i32
    %c0_i32_1 = arith.constant 0 : i32
    return %c0_i32, %c0_i32_0 : i32, i32
  }
  func.func @transform_11(%arg0: i32) -> (i32, i32) {
    %c0_i32 = arith.constant 0 : i32
    %c0_i32_0 = arith.constant 0 : i32
    %c0_i32_1 = arith.constant 0 : i32
    return %c0_i32, %c0_i32_0 : i32, i32
  }
  func.func @transform_12(%arg0: i32) -> (i32, i32) {
    %c0_i32 = arith.constant 0 : i32
    %c0_i32_0 = arith.constant 0 : i32
    %c0_i32_1 = arith.constant 0 : i32
    return %c0_i32, %c0_i32_0 : i32, i32
  }
  func.func @transform_13(%arg0: i32) -> (i32, i32) {
    %c0_i32 = arith.constant 0 : i32
    %c0_i32_0 = arith.constant 0 : i32
    %c0_i32_1 = arith.constant 0 : i32
    return %c0_i32, %c0_i32_0 : i32, i32
  }
  func.func @transform_14(%arg0: i32) -> (i32, i32, i32) {
    %c0_i32 = arith.constant 0 : i32
    %c0_i32_0 = arith.constant 0 : i32
    %c0_i32_1 = arith.constant 0 : i32
    return %arg0, %c0_i32, %c0_i32_0 : i32, i32, i32
  }
}

</mosaic_0001>

<bundles_post_ra>
// kernel: tpu_custom_call.1
= control target key start
LH: loop header
LB: loop body
LE: loop exit
PB: predicated region body
PF: predicated region fallthrough
CT: control target
= control target key end

     0   :  { %s1759_s0 = inlined_call_operand.vmem [shape: f32[2,8,32], index: 0, kind: input, shape index: {}]   ;;  %s1760_s1 = inlined_call_operand.hbm [shape: f32[8,8], index: 1, kind: input, shape index: {}]   ;;  %s1761_s2 = inlined_call_operand.vmem [shape: bf16[32,96], index: 2, kind: input, shape index: {}]   ;;  %s1762_s3 = inlined_call_operand.vmem [shape: f32[1,96], index: 3, kind: input, shape index: {}]   ;;  %s1763_s4 = inlined_call_operand.vmem [shape: bf16[4,8,32], index: 4, kind: input, shape index: {}]   ;;  %s1764_s5 = inlined_call_operand.vmem [shape: f32[1,32], index: 5, kind: input, shape index: {}]   ;;  %s1765_s6 = inlined_call_operand.vmem [shape: f32[1,32], index: 6, kind: input, shape index: {}]   ;;  %s1766_s7 = inlined_call_operand.vmem [shape: f32[1,32], index: 7, kind: input, shape index: {}]   ;;  %s1767_s8 = inlined_call_operand.hbm [shape: bf16[32,64], index: 8, kind: input, shape index: {}]   ;;  %s1768_s9 = inlined_call_operand.vmem [shape: f32[1,64], index: 9, kind: input, shape index: {}]   ;;  %s1769_s10 = inlined_call_operand.vmem [shape: bf16[64,32], index: 10, kind: input, shape index: {}]   ;;  %s1770_s11 = inlined_call_operand.vmem [shape: f32[1,32], index: 11, kind: input, shape index: {}]   ;;  %s1771_s12 = inlined_call_operand.vmem [shape: f32[1,32], index: 12, kind: input, shape index: {}]   ;;  %s1772_s13 = inlined_call_operand.vmem [shape: f32[1,32], index: 13, kind: input, shape index: {}]   ;;  %s1773_s14 = inlined_call_operand.hbm [shape: f32[2,8,32], index: 14, kind: output, shape index: {}]  }
   0x1   :  { %1778 = sst [smem:[#allocation15_spill]] %s1759_s0 }
   0x2   :  { %19 = vsyncpa [#allocation3], 0 }
   0x3   :  { %20 = vsyncpa [#allocation6], 0 }
   0x4   :  { %21 = vsyncpa [#allocation4], 0 }
   0x5   :  { %23 = vsyncpa [#allocation4 + $0x1], 0  ;;  %s1528_s29 = smov 0   ;;  %s1530_s30 = smov 0  }
   0x6   :  { %s1532_s15 = smov 0   ;;  %s1534_s16 = smov 0  }
   0x7 LB: > { %1779 = sst [smem:[#allocation11_spill]] %s1431_s15  ;;  %s1549_s17 = sadd.s32 4294967295, %s1435_s16   ;;  %s1435_s16 = sphi %s1534_s16, %s1788_s16   ;;  %s1431_s15 = sphi %s1532_s15, %s1790_s15   ;;  %s1427_s30 = sphi %s1530_s30, %s1792_s30   ;;  %s1423_s29 = sphi %s1528_s29, %s1791_s29  }
   0x8   : > { %s1129_s18 = sadd.s32 4294967294, %s1435_s16   ;;  %s1553_s19 = sadd.s32 1, %s1435_s16  }
   0x9   : > { %1780 = sst [smem:[#allocation12_spill]] %s1553_s19  ;;  %s335_s20 = sadd.s32 1, %s1431_s15 }
   0xa   : > { %s332_s21 = ssub.s32 %s1435_s16, %s1553_s19  ;;  %p345_p0 = scmp.ne.s32.totalorder %s1431_s15, %s1427_s30 }
   0xb   : > { %p333_p1 = scmp.eq.s32.totalorder %s332_s21, 0  ;;  %p346_p2 = scmp.eq.s32.totalorder %s1549_s17, 1 }
   0xc   : > { %p351_p3 = scmp.ne.s32.totalorder %s1427_s30, %s1423_s29  ;;  %p352_p4 = scmp.eq.s32.totalorder %s1129_s18, 1 }
   0xd   : > { %s1564_s22 = scalar_select %p333_p1, %s1431_s15, %s335_s20  }
   0xe   : > { %p1566_p5 = por %p346_p2, %p345_p0  ;;  %p1570_p6 = por %p352_p4, %p351_p3 }
   0xf   : > { %1781 = sst [smem:[#allocation13_spill]] %s1564_s22  ;;  %p1130_p7 = scmp.ge.s32.totalorder %s1435_s16, 1 }
  0x10   : > { %s1783_s24 = scalar_select %p1570_p6, 1, 0 }
  0x11   : > { %p359_p8 = scmp.lt.s32.totalorder %s1435_s16, 3  ;;  %p1222_p9 = scmp.eq.s32.totalorder %s1549_s17, 0 }
  0x12   : > { %1784 = sst [smem:[#allocation14_spill]] %s1783_s24  ;;  %s371_s28 = sshll.u32 %s1760_s1, 4  ;;  %s372_s28 = int_to_ptr.hbm [resolvable:$true] %s371_s28 }
  0x13   : > { %p1577_p10 = pnand %p1130_p7, %p359_p8  ;;  %s1437_s18 = smov [#allocation2]  }
  0x14   : > { %s373_s20 = sshll.u32 %s1437_s18, 4  ;;  %s400_s15 = sshll.u32 %s1767_s8, 4  ;;  %s374_s20 = int_to_ptr.vmem [resolvable:$true] %s373_s20  ;;  %s401_s15 = int_to_ptr.hbm [resolvable:$true] %s400_s15 }
  0x15   : > { %p1211_p11 = pneg %p1577_p10  ;;  %s1438_s19 = smov [#allocation5]  }
  0x16   : > { %s402_s24 = sshll.u32 %s1438_s19, 4  ;;  %s1439_s26 = smov 64   ;;  %s403_s24 = int_to_ptr.vmem [resolvable:$true] %s402_s24 }
  0x17   : > { %p1212_p12 = pnand %p1222_p9, %p1211_p11  ;;  %s1440_s27 = smov 4  }
  0x18   : > { %440 = sbr.rel (%p1577_p10) target bundleno = 2313 (0x909), region = 76 }
  0x19   : > { %1214 = dma.hbm_to_vmem [thread:$0]  (!%p1212_p12), %s372_s28, 128, %s374_s20, [#allocation3]  }
  0x1a   : > { %1217 = dma.hbm_to_vmem [thread:$0]  (!%p1212_p12), %s401_s15, 256, %s403_s24, [#allocation6], %s1439_s26, %s1439_s26, %s1440_s27  }
  0x1d   : > { %1410 = dma.done.wait (%p1222_p9), [#allocation3], 128  }
  0x1e   : > { %1412 = vsyncadd (%p1222_p9), [#allocation3], 4294967168 }
  0x1f   : > { %1414 = dma.done.wait (%p1222_p9), [#allocation6], 256  }
  0x20   : > { %1416 = vsyncadd (%p1222_p9), [#allocation6], 4294967040  ;;  %p491_p13 = scmp.lt.s32.totalorder %s1549_s17, 1  ;;  %s1786_s0 = sld [smem:[#allocation15_spill]]  ;;  %v1194_v0 = vld [vmem:[%s1761_s2 + $0x8] sm:$0xff]  ;;  %v1193_v1 = vld [vmem:[%s1761_s2] sm:$0xff] }
  0x21   : > { %529 = vmatpush.bf16.msra.mxu0 %v1194_v0  ;;  %vm519_vm0 = vcmask 261120   ;;  %v1275_v4 = vld [vmem:[%s1762_s3] ss:$0 sm:$0xff]  ;;  %s1443_s22 = smov 120   ;;  %s1444_s24 = smov 80   ;;  %vm542_vm1 = vcmask 64512  }
  0x22   : > { %s492_s19 = scalar_select %p491_p13, %s1549_s17, 1  ;;  %vm581_vm2 = vcmask 1043456   ;;  %v599_v16 = vld [vmem:[%s1763_s4] sm:$0xf]  ;;  %v1152_v0 = vld [vmem:[%s1763_s4 + $0x4] sm:$0xf] }
  0x23   : > { %s1446_s28 = smov 112   ;;  %v684_v19 = vsel %vm581_vm2, %v599_v16, 0  ;;  %v1639_v24 = vld [vmem:[#allocation2] sm:$0xff]  ;;  %s1447_s21 = smov 56   ;;  %vm981_vm7 = vcmask 523264  }
  0x24   : > { %s1138_s15 = sshll.u32 %s492_s19, 3  ;;  %s1441_s19 = smov 88  }
  0x25   : > { %530 = vmatpush.bf16.msra.mxu0 %v1193_v1  ;;  %s1448_s26 = smov 40   ;;  %s1449_s27 = smov 64   ;;  %v665_v1 = vsel %vm581_vm2, %v1152_v0, 0 }
  0x26   : > { %s494_s25 = scalar_lea.vmem %s1786_s0, %s1138_s15  ;;  %s1442_s15 = smov 96  }
  0x27   : > { %v1612_v2 = vld [vmem:[%s494_s25] sm:$0xff]  ;;  %s1445_s25 = smov 72   ;;  %s1190_s18 = sshll.u32 %s1549_s17, 3 }
  0x28   : > { %v498_v3 = vpack.c.bf16 %v1612_v2, %v1612_v2 }
  0x29   : > { %674 = vmatpush.bf16.msrb.mxu0 %v665_v1 }
  0x2a   : > { %1147 = vmatmul.msk.bf16.vlgmr.msra.gmra.mxu0 %vm519_vm0, %v498_v3 }
  0xa7   : > { %v532_v5 = vpop.f32.mrf.mxu0 }
  0xa8   : > { %v533_v6 = vadd.f32 %v1275_v4, %v532_v5 }
  0xaa   : > { %v536_v7 = vpack.c.bf16 %v533_v6, %v533_v6 }
  0xac   : > { %v538_v8 = vunpack.c.l.b16 %v536_v7 }
  0xae   : > { %v1620_v9 = vpack.c.b16 %v538_v8, %v538_v8 }
  0xaf   : > { %v534_v10 = vpop.f32.mrf.mxu0 }
  0xb0   : > { %602 = vrot.lane.b32.xlu2 %v1620_v9, %s1441_s19  ;;  %540 = vrot.lane.b32.xlu0 %v1620_v9, %s1442_s15  ;;  %s1450_s19 = smov 104  }
  0xb8   : > { %600 = vrot.lane.b32.xlu2 %v1620_v9, %s1443_s22 }
  0xc0   : > { %701 = vrot.lane.b32.xlu2 %v1620_v9, %s1444_s24  ;;  %s1451_s24 = smov 48  }
  0xc8   : > { %782 = vrot.lane.b32.xlu2 %v1620_v9, %s1445_s25  ;;  %s488_s25 = sand.u32 1, %s1427_s30  }
  0xc9   : > { %s1033_s20 = scalar_lea.sflag [#allocation4], %s488_s25 }
  0xd0   : > { %699 = vrot.lane.b32.xlu2 %v1620_v9, %s1446_s28  ;;  %s1137_s28 = sshll.u32 %s488_s25, 3 }
 0x10a   : > { %v603_v11 = vpop.permute.xlu2 %602 }
 0x10b   : > { %v608_v12 = vsel %vm542_vm1, %v603_v11, 0 }
 0x10c   : > { %617 = vmatpush.bf16.xpose.msra.mxu3 %v608_v12 }
 0x112   : > { %v601_v13 = vpop.permute.xlu2 %600 }
 0x113   : > { %1150 = vmatmul.msk.bf16.vlgmr.msra.gmra.mxu3 %vm542_vm1, %v601_v13 }
 0x11a   : > { %v702_v14 = vpop.permute.xlu2 %701 }
 0x11b   : > { %v707_v15 = vsel %vm542_vm1, %v702_v14, 0 }
 0x11c   : > { %716 = vmatpush.bf16.xpose.msrb.mxu3 %v707_v15 }
 0x122   : > { %v783_v17 = vpop.permute.xlu2 %782  ;;  %v541_v18 = vpop.permute.xlu0 %540 }
 0x123   : > { %v547_v20 = vsel %vm542_vm1, %v541_v18, 0  ;;  %v788_v22 = vsel %vm542_vm1, %v783_v17, 0 }
 0x124   : > { %556 = vmatpush.bf16.xpose.msra.mxu1 %v547_v20 }
 0x12a   : > { %v700_v21 = vpop.permute.xlu2 %699 }
 0x12b   : > { %1148 = vmatmul.msk.bf16.vlgmr.msra.gmra.mxu1 %vm542_vm1, %v536_v7  ;;  %1155 = vmatmul.msk.bf16.vlgmr.msrb.gmra.mxu3 %vm542_vm1, %v700_v21 }
 0x12c   : > { %693 = vmatpush.bf16.msrb.mxu1 %v684_v19 }
 0x130   : > { %797 = vmatpush.bf16.xpose.msra.mxu1 %v788_v22 }
 0x196   : > { %v619_v23 = vpop.f32.mrf.mxu3 }
 0x197   : > { %v623_v25 = vmul.f32 0.35355338, %v619_v23 }
 0x199   : > { %v624_v26 = vadd.f32 %v623_v25, %v1639_v24 }
 0x19b   : > { %v625_v27 = vsel %vm542_vm1, %v624_v26, -inf }
 0x19c   : > { %626 = vmax.xlane.f32.xlu2 %v625_v27 }
 0x19e   : > { %v621_v28 = vpop.f32.mrf.mxu3 }
 0x1a8   : > { %v558_v29 = vpop.f32.mrf.mxu1 }
 0x1a9   : > { %v562_v30 = vmul.f32 0.35355338, %v558_v29 }
 0x1ab   : > { %v563_v31 = vadd.f32 %v562_v30, %v1639_v24 }
 0x1ad   : > { %v564_v32 = vsel %vm542_vm1, %v563_v31, -inf }
 0x1ae   : > { %v718_v33 = vpop.f32.mrf.mxu3  ;;  %565 = vmax.xlane.f32.xlu0 %v564_v32 }
 0x1af   : > { %v722_v34 = vmul.f32 0.35355338, %v718_v33  ;;  %v1161_v33 = vld [vmem:[%s1763_s4 + $0xc] sm:$0xf] }
 0x1b0   : > { %v560_v35 = vpop.f32.mrf.mxu1 }
 0x1b1   : > { %v1646_v36 = vadd.f32 %v722_v34, %v1639_v24 }
 0x1b3   : > { %v724_v37 = vsel %vm542_vm1, %v1646_v36, -inf }
 0x1b6   : > { %v720_v38 = vpop.f32.mrf.mxu3  ;;  %725 = vmax.xlane.f32.xlu0 %v724_v37 }
 0x1b7   : > { %v845_v38 = vsel %vm581_vm2, %v1161_v33, 0 }
 0x20f   : > { %v627_v39 = vpop.xlane.xlu2 %626 }
 0x210   : > { %v628_v40 = vsub.f32 %v624_v26, %v627_v39 }
 0x212   : > { %v629_v41 = vmul.f32 1.442695, %v628_v40 }
 0x214   : > { %1283 = vpow2.f32 %v629_v41  ;;  %v1157_v41 = vld [vmem:[%s1763_s4 + $0x8] sm:$0xf] }
 0x21a   : > { %v1284_v42 = vpop.eup %1283 }
 0x21b   : > { %v631_v43 = vsel %vm542_vm1, %v1284_v42, 0.0 }
 0x21c   : > { %632 = vadd.xlane.f32.xlu0 %v631_v43 }
 0x221   : > { %v566_v44 = vpop.xlane.xlu0 %565 }
 0x222   : > { %v567_v45 = vsub.f32 %v563_v31, %v566_v44 }
 0x224   : > { %v568_v46 = vmul.f32 1.442695, %v567_v45 }
 0x226   : > { %1285 = vpow2.f32 %v568_v46 }
 0x229   : > { %v726_v49 = vpop.xlane.xlu0 %725 }
 0x22a   : > { %v727_v13 = vsub.f32 %v1646_v36, %v726_v49 }
 0x22c   : > { %v1286_v47 = vpop.eup %1285  ;;  %v728_v14 = vmul.f32 1.442695, %v727_v13  ;;  %v1199_v13 = vld [vmem:[%s1769_s10 + $0x10] sm:$0xff] }
 0x22d   : > { %v570_v48 = vsel %vm542_vm1, %v1286_v47, 0.0 }
 0x22e   : > { %571 = vadd.xlane.f32.xlu1 %v570_v48 }
 0x230   : > { %637 = vrot.lane.b32.xlu0 %v1620_v9, %s1447_s21 }
 0x238   : > { %817 = vrot.lane.b32.xlu0 %v1620_v9, %s1448_s26 }
 0x247   : > { %576 = vrot.lane.b32.xlu1 %v1620_v9, %s1449_s27 }
 0x24f   : > { %780 = vrot.lane.b32.xlu1 %v1620_v9, %s1450_s19  ;;  %s1043_s19 = scalar_lea.hbm %s1773_s14, %s1190_s18 }
 0x250   : > { %s1047_s0 = sshll.u32 %s1043_s19, 4  ;;  %s1048_s0 = int_to_ptr.hbm [resolvable:$true] %s1047_s0 }
 0x251   : > { %s1379_s21 = sshra.s32 %s1048_s0, 4  ;;  %s1380_s21 = int_to_ptr.hbm [resolvable:$true] %s1379_s21 }
 0x252   : > { %s1381_s18 = scalar_lea.hbm %s1380_s21, 8  ;;  %p1386_p3 = scmp.lt.s32.totalorder %s1380_s21, %s1773_s14 }
 0x253   : > { %p1382_p0 = scmp.ne.s32.totalorder %s1380_s21, %s1381_s18 }
 0x255   : > { %p1383_p1 = pnand %p1382_p0, %p1566_p5 }
 0x257   : > { %p1384_p2 = pneg %p1383_p1 }
 0x28f   : > { %v633_v50 = vpop.xlane.xlu0 %632 }
 0x2a1   : > { %v572_v54 = vpop.xlane.xlu1 %571 }
 0x2a2   : > { %v638_v51 = vpop.permute.xlu0 %637  ;;  %1287 = vrcp.f32 %v572_v54 }
 0x2a3   : > { %v643_v59 = vsel %vm581_vm2, %v638_v51, 0  ;;  %1289 = vrcp.f32 %v633_v50  ;;  %v1276_v51 = vld [vmem:[%s1764_s5] ss:$0 sm:$0xff] }
 0x2a4   : > { %1291 = vpow2.f32 %v728_v14 }
 0x2a8   : > { %v1288_v55 = vpop.eup %1287 }
 0x2a9   : > { %v574_v56 = vmul.f32 %v1288_v55, %v1286_v47  ;;  %v1290_v61 = vpop.eup %1289 }
 0x2aa   : > { %v818_v52 = vpop.permute.xlu0 %817  ;;  %v635_v62 = vmul.f32 %v1290_v61, %v1284_v42  ;;  %v1292_v23 = vpop.eup %1291  ;;  %v764_v42 = vsel %vm581_vm2, %v1157_v41, 0 }
 0x2ab   : > { %v823_v53 = vsel %vm581_vm2, %v818_v52, 0  ;;  %v575_v60 = vpack.c.bf16 %v574_v56, %v574_v56  ;;  %v730_v25 = vsel %vm542_vm1, %v1292_v23, 0.0  ;;  %773 = vmatpush.bf16.msra.mxu0 %v764_v42 }
 0x2ac   : > { %832 = vmatpush.bf16.msra.mxu3 %v823_v53  ;;  %v636_v63 = vpack.c.bf16 %v635_v62, %v635_v62 }
 0x2b9   : > { %v577_v57 = vpop.permute.xlu1 %576 }
 0x2ba   : > { %v583_v58 = vsel %vm581_vm2, %v577_v57, 0 }
 0x2bb   : > { %592 = vmatpush.bf16.msra.mxu2 %v583_v58 }
 0x2be   : > { %1149 = vmatmul.msk.bf16.vlgmr.msra.gmra.mxu2 %vm542_vm1, %v575_v60 }
 0x2bf   : > { %652 = vmatpush.bf16.msrb.mxu2 %v643_v59  ;;  %v1452_v59 = vmov 32.0  }
 0x2c1   : > { %v781_v8 = vpop.permute.xlu1 %780 }
 0x2ce   : > { %1151 = vmatmul.msk.bf16.vlgmr.msrb.gmra.mxu2 %vm542_vm1, %v636_v63 }
 0x341   : > { %v594_v3 = vpop.f32.mrf.mxu2 }
 0x342   : > { %v598_v4 = vpack.c.bf16 %v594_v3, %v594_v3 }
 0x344   : > { %1154 = vmatmul.msk.bf16.vlgmr.msrb.gmra.mxu1 %vm542_vm1, %v598_v4 }
 0x349   : > { %v596_v5 = vpop.f32.mrf.mxu2 }
 0x351   : > { %v654_v6 = vpop.f32.mrf.mxu2 }
 0x352   : > { %v658_v7 = vpack.c.bf16 %v654_v6, %v654_v6 }
 0x354   : > { %1153 = vmatmul.msk.bf16.vlgmr.msrb.gmra.mxu0 %vm542_vm1, %v658_v7  ;;  %1159 = vmatmul.msk.bf16.vlgmr.msra.gmra.mxu1 %vm542_vm1, %v781_v8  ;;  %v1195_v8 = vld [vmem:[#allocation5] sm:$0xff] }
 0x359   : > { %v656_v10 = vpop.f32.mrf.mxu2 }
 0x35a   : > { %v1200_v10 = vld [vmem:[%s1769_s10 + $0x18] sm:$0xff] }
 0x35b   : > { %989 = vmatpush.bf16.msrb.mxu1 %v1200_v10 }
 0x35f   : > { %990 = vmatpush.bf16.msrb.mxu1 %v1199_v13 }
 0x3c1   : > { %v695_v11 = vpop.f32.mrf.mxu1 }
 0x3c9   : > { %v697_v12 = vpop.f32.mrf.mxu1 }
 0x3d1   : > { %v676_v15 = vpop.f32.mrf.mxu0  ;;  %v799_v16 = vpop.f32.mrf.mxu1 }
 0x3d2   : > { %v696_v17 = vadd.f32 %v695_v11, %v676_v15  ;;  %v803_v18 = vmul.f32 0.35355338, %v799_v16 }
 0x3d4   : > { %v804_v19 = vadd.f32 %v803_v18, %v1639_v24 }
 0x3d6   : > { %v805_v20 = vsel %vm542_vm1, %v804_v19, -inf }
 0x3d7   : > { %806 = vmax.xlane.f32.xlu1 %v805_v20 }
 0x3d9   : > { %v678_v21 = vpop.f32.mrf.mxu0  ;;  %v801_v22 = vpop.f32.mrf.mxu1 }
 0x3da   : > { %v1277_v21 = vld [vmem:[%s1765_s6] ss:$0 sm:$0xff] }
 0x3df   : > { %731 = vadd.xlane.f32.xlu1 %v730_v25 }
 0x44a   : > { %v807_v26 = vpop.xlane.xlu1 %806 }
 0x44b   : > { %v808_v27 = vsub.f32 %v804_v19, %v807_v26 }
 0x44d   : > { %v809_v28 = vmul.f32 1.442695, %v808_v27 }
 0x44f   : > { %1293 = vpow2.f32 %v809_v28 }
 0x452   : > { %v732_v24 = vpop.xlane.xlu1 %731 }
 0x453   : > { %1295 = vrcp.f32 %v732_v24  ;;  %v1279_v24 = vld [vmem:[%s1768_s9] ss:$0 sm:$0xff] }
 0x455   : > { %v1294_v29 = vpop.eup %1293 }
 0x456   : > { %v811_v30 = vsel %vm542_vm1, %v1294_v29, 0.0 }
 0x457   : > { %812 = vadd.xlane.f32.xlu2 %v811_v30  ;;  %v1197_v30 = vld [vmem:[%s1769_s10] sm:$0xff] }
 0x459   : > { %v1296_v32 = vpop.eup %1295 }
 0x45a   : > { %v734_v35 = vmul.f32 %v1296_v32, %v1292_v23  ;;  %v1278_v23 = vld [vmem:[%s1766_s7] ss:$0 sm:$0xff] }
 0x46f   : > { %736 = vrot.lane.b32.xlu2 %v1620_v9, %s1451_s24  ;;  %v735_v9 = vpack.c.bf16 %v734_v35, %v734_v35  ;;  %s490_s24 = scalar_lea.vmem [#allocation7], %s1137_s28  ;;  %s1385_s28 = scalar_lea.hbm %s1773_s14, 16 }
 0x470   : > { %s1045_s17 = sshll.u32 %s490_s24, 4  ;;  %p1387_p4 = scmp.lt.s32.totalorder %s1385_s28, %s1381_s18  ;;  %s1046_s17 = int_to_ptr.vmem [resolvable:$true] %s1045_s17 }
 0x472   : > { %p1388_p7 = por %p1387_p4, %p1386_p3 }
 0x474   : > { %p1389_p8 = pnand %p1388_p7, %p1384_p2 }
 0x4ca   : > { %v813_v31 = vpop.xlane.xlu2 %812 }
 0x4cb   : > { %1297 = vrcp.f32 %v813_v31 }
 0x4cc   : > { %1299 = vrcp.f32 %v1452_v59 }
 0x4d1   : > { %v1298_v34 = vpop.eup %1297 }
 0x4d2   : > { %v815_v36 = vmul.f32 %v1298_v34, %v1294_v29  ;;  %v737_v37 = vpop.permute.xlu2 %736  ;;  %v1300_v60 = vpop.eup %1299  ;;  %v1198_v29 = vld [vmem:[%s1769_s10 + $0x8] sm:$0xff] }
 0x4d3   : > { %v742_v39 = vsel %vm581_vm2, %v737_v37, 0  ;;  %v871_v61 = vmul.f32 32.0, %v1300_v60  ;;  %vm875_vm3 = vweird.f32 %v1300_v60  ;;  %991 = vmatpush.bf16.msrb.mxu1 %v1198_v29 }
 0x4d4   : > { %v816_v40 = vpack.c.bf16 %v815_v36, %v815_v36  ;;  %751 = vmatpush.bf16.msra.mxu2 %v742_v39  ;;  %v1280_v36 = vld [vmem:[%s1770_s11] ss:$0 sm:$0xff] }
 0x4d5   : > { %v872_v62 = vsub.f32 1.0, %v871_v61 }
 0x4d6   : > { %1160 = vmatmul.msk.bf16.vlgmr.msra.gmra.mxu3 %vm542_vm1, %v816_v40 }
 0x4d7   : > { %1156 = vmatmul.msk.bf16.vlgmr.msra.gmra.mxu2 %vm542_vm1, %v735_v9  ;;  %v873_v63 = vmul.f32 %v1300_v60, %v872_v62  ;;  %992 = vmatpush.bf16.msrb.mxu1 %v1197_v30 }
 0x4d8   : > { %854 = vmatpush.bf16.msrb.mxu2 %v845_v38 }
 0x4d9   : > { %v874_v0 = vadd.f32 %v1300_v60, %v873_v63 }
 0x4db   : > { %v876_v1 = vsel %vm875_vm3, %v1300_v60, %v874_v0 }
 0x559   : > { %v834_v43 = vpop.f32.mrf.mxu3 }
 0x55a   : > { %v838_v44 = vpack.c.bf16 %v834_v43, %v834_v43  ;;  %v753_v45 = vpop.f32.mrf.mxu2 }
 0x55b   : > { %v757_v46 = vpack.c.bf16 %v753_v45, %v753_v45 }
 0x55c   : > { %1162 = vmatmul.msk.bf16.vlgmr.msrb.gmra.mxu2 %vm542_vm1, %v838_v44 }
 0x55d   : > { %1158 = vmatmul.msk.bf16.vlgmr.msra.gmra.mxu0 %vm542_vm1, %v757_v46 }
 0x561   : > { %v836_v47 = vpop.f32.mrf.mxu3 }
 0x562   : > { %v755_v48 = vpop.f32.mrf.mxu2 }
 0x5da   : > { %v775_v49 = vpop.f32.mrf.mxu0 }
 0x5db   : > { %v779_v50 = vadd.f32 %v775_v49, %v696_v17 }
 0x5df   : > { %v856_v52 = vpop.f32.mrf.mxu2 }
 0x5e0   : > { %v860_v53 = vadd.f32 %v856_v52, %v779_v50 }
 0x5e2   : > { %v865_v54 = vadd.f32 %v1276_v51, %v860_v53  ;;  %v777_v55 = vpop.f32.mrf.mxu0 }
 0x5e3   : > { %v1281_v55 = vld [vmem:[%s1771_s12] ss:$0 sm:$0xff] }
 0x5e4   : > { %v866_v56 = vadd.f32 %v865_v54, %v1612_v2  ;;  %v1196_v2 = vld [vmem:[#allocation5 + $0x8] sm:$0xff] }
 0x5e5   : > { %936 = vmatpush.bf16.msrb.mxu0 %v1196_v2 }
 0x5e6   : > { %v867_v57 = vsel %vm519_vm0, %v866_v56, 0.0 }
 0x5e7   : > { %v858_v58 = vpop.f32.mrf.mxu2  ;;  %868 = vadd.xlane.f32.xlu1 %v867_v57 }
 0x5e8   : > { %v1282_v58 = vld [vmem:[%s1772_s13] ss:$0 sm:$0xff] }
 0x5e9   : > { %937 = vmatpush.bf16.msrb.mxu0 %v1195_v8 }
 0x65a   : > { %v869_v3 = vpop.xlane.xlu1 %868 }
 0x65b   : > { %v877_v4 = vmul.f32 %v876_v1, %v869_v3 }
 0x65d   : > { %v878_v5 = vsub.f32 %v866_v56, %v877_v4 }
 0x65f   : > { %v879_v6 = vmul.f32 %v878_v5, %v878_v5 }
 0x661   : > { %v880_v7 = vsel %vm519_vm0, %v879_v6, 0.0 }
 0x662   : > { %881 = vadd.xlane.f32.xlu0 %v880_v7 }
 0x6d5   : > { %v882_v11 = vpop.xlane.xlu0 %881 }
 0x6d6   : > { %v883_v12 = vmul.f32 %v882_v11, %v876_v1 }
 0x6d8   : > { %v884_v14 = vadd.f32 1e-05, %v883_v12 }
 0x6da   : > { %1301 = vrsqrt.f32 %v884_v14  ;;  %vm891_vm5 = vweird.f32 %v884_v14 }
 0x6e0   : > { %v1302_v15 = vpop.eup %1301 }
 0x6e1   : > { %v886_v16 = vmul.f32 %v1302_v15, %v884_v14  ;;  %vm892_vm4 = vweird.f32 %v1302_v15 }
 0x6e2   : > { %vm893_vm6 = vmor %vm891_vm5, %vm892_vm4 }
 0x6e3   : > { %v887_v17 = vmul.f32 %v1302_v15, %v886_v16 }
 0x6e5   : > { %v888_v18 = vmul.f32 0.5, %v887_v17 }
 0x6e7   : > { %v889_v19 = vsub.f32 1.5, %v888_v18 }
 0x6e9   : > { %v890_v20 = vmul.f32 %v1302_v15, %v889_v19 }
 0x6eb   : > { %v894_v22 = vsel %vm893_vm6, %v1302_v15, %v890_v20 }
 0x6ec   : > { %v895_v25 = vmul.f32 %v894_v22, %v878_v5 }
 0x6ee   : > { %v900_v26 = vmul.f32 %v1277_v21, %v895_v25 }
 0x6f0   : > { %v905_v27 = vadd.f32 %v1278_v23, %v900_v26 }
 0x6f2   : > { %v906_v28 = vpack.c.bf16 %v905_v27, %v905_v27 }
 0x6f4   : > { %1171 = vmatmul.msk.bf16.vlgmr.msrb.gmra.mxu0 %vm519_vm0, %v906_v28 }
 0x771   : > { %v939_v31 = vpop.f32.mrf.mxu0 }
 0x772   : > { %v940_v32 = vadd.f32 %v1279_v24, %v939_v31 }
 0x774   : > { %v943_v33 = vmax.f32 %v940_v32, 0.0 }
 0x776   : > { %v944_v34 = vpack.c.bf16 %v943_v33, %v943_v33 }
 0x778   : > { %1188 = vmatmul.msk.bf16.vlgmr.msrb.gmra.mxu1 %vm981_vm7, %v944_v34 }
 0x779   : > { %v941_v35 = vpop.f32.mrf.mxu0 }
 0x7f5   : > { %v994_v37 = vpop.f32.mrf.mxu1 }
 0x7f6   : > { %v995_v38 = vadd.f32 %v1280_v36, %v994_v37 }
 0x7f8   : > { %v998_v39 = vadd.f32 %v995_v38, %v905_v27 }
 0x7fa   : > { %v999_v40 = vsel %vm519_vm0, %v998_v39, 0.0 }
 0x7fb   : > { %1000 = vadd.xlane.f32.xlu1 %v999_v40 }
 0x7fd   : > { %v996_v9 = vpop.f32.mrf.mxu1 }
 0x86e   : > { %v1001_v41 = vpop.xlane.xlu1 %1000 }
 0x86f   : > { %v1002_v42 = vmul.f32 %v1001_v41, %v876_v1 }
 0x871   : > { %v1003_v43 = vsub.f32 %v998_v39, %v1002_v42 }
 0x873   : > { %v1004_v44 = vmul.f32 %v1003_v43, %v1003_v43 }
 0x875   : > { %v1005_v45 = vsel %vm519_vm0, %v1004_v44, 0.0 }
 0x876   : > { %1006 = vadd.xlane.f32.xlu1 %v1005_v45 }
 0x8e9   : > { %v1007_v46 = vpop.xlane.xlu1 %1006 }
 0x8ea   : > { %v1008_v47 = vmul.f32 %v1007_v46, %v876_v1 }
 0x8ec   : > { %v1009_v48 = vadd.f32 1e-05, %v1008_v47 }
 0x8ee   : > { %1303 = vrsqrt.f32 %v1009_v48  ;;  %vm1016_vm9 = vweird.f32 %v1009_v48 }
 0x8f4   : > { %v1304_v49 = vpop.eup %1303 }
 0x8f5   : > { %v1011_v50 = vmul.f32 %v1304_v49, %v1009_v48  ;;  %vm1017_vm8 = vweird.f32 %v1304_v49 }
 0x8f6   : > { %vm1018_vm10 = vmor %vm1016_vm9, %vm1017_vm8 }
 0x8f7   : > { %v1012_v51 = vmul.f32 %v1304_v49, %v1011_v50 }
 0x8f9   : > { %v1013_v52 = vmul.f32 0.5, %v1012_v51 }
 0x8fb   : > { %v1014_v53 = vsub.f32 1.5, %v1013_v52 }
 0x8fd   : > { %v1015_v54 = vmul.f32 %v1304_v49, %v1014_v53 }
 0x8ff   : > { %v1019_v56 = vsel %vm1018_vm10, %v1304_v49, %v1015_v54 }
 0x900   : > { %v1020_v57 = vmul.f32 %v1019_v56, %v1003_v43 }
 0x902   : > { %v1025_v59 = vmul.f32 %v1281_v55, %v1020_v57 }
 0x904   : > { %v1030_v60 = vadd.f32 %v1282_v58, %v1025_v59 }
 0x906   : > { %1031 = vst.msk [vmem:[%s490_s24] sm:$0xff] %vm519_vm0, %v1030_v60 }
 0x907   : > { %1392 = shalt.err (!%p1389_p8)
}
 0x908   : > { %1209 = dma.vmem_to_hbm [thread:$0]  (%p1566_p5), %s1046_s17, 128, %s1048_s0, %s1033_s20  }
 0x909 PF: > { %p1226_p9 = scmp.ge.s32.totalorder %s1435_s16, 2  ;;  %s1059_s22 = sand.u32 1, %s1423_s29  }
 0x90a   : > { %s1060_s24 = scalar_lea.sflag [#allocation4], %s1059_s22 }
 0x90b   : > { %p1219_p10 = pnand %p1226_p9, %p1570_p6 }
 0x90d   : > { %p1220_p11 = pneg %p1219_p10 }
 0x90f   : > { %1418 = dma.done.wait (%p1220_p11), %s1060_s24, 128  }
 0x910   : > { %1420 = vsyncadd (%p1220_p11), %s1060_s24, 4294967168  ;;  %s1788_s16 = sld [smem:[#allocation12_spill]]  ;;  %s1791_s29 = smov %s1427_s30 }
 0x911   : > { %s1789_s21 = sld [smem:[#allocation11_spill]] }
 0x912   : > { %s1790_s15 = sld [smem:[#allocation13_spill]] }
 0x916   : > { %p26_p12 = scmp.ge.s32.totalorder %s1788_s16, 4  }
 0x917   : > { %s1792_s30 = smov %s1789_s21 }
 0x918   :  { %28 = sbr.rel (!%p26_p12) target bundleno = 7 (0x7), region = 123 }
 0x91d   :  { %1066 = vsyncpa [#allocation3], 1 }
 0x91e   :  { %1068 = vsyncpa [#allocation3 + $0x1], 1 }
 0x91f   :  { %1069 = vsyncpa [#allocation6], 1 }
 0x920   :  { %1070 = vsyncpa [#allocation4], 1 }
 0x921   :  { %1072 = vsyncpa [#allocation4 + $0x1], 1 }

</bundles_post_ra>
